<compile_context>
chip_gen: v5e
topology: v5e:2x2
jax: 0.10.0
libtpu: 0.0.40
codegen_flags: <defaults>
</compile_context>

<pallas_src>
import functools

import jax
import jax.numpy as jnp
from jax import lax
from jax.experimental import pallas as pl
from jax.experimental.pallas import tpu as pltpu


def _se_kernel(x_ref, w1_ref, w2_ref, o_ref, acc_ref, *, L, TL):
    # x_ref: (TB, C, TL); w1_ref: (H, C); w2_ref: (C, H)
    # o_ref: (TB, C);     acc_ref: (TB, C) f32 scratch (persists across grid)
    l = pl.program_id(1)

    @pl.when(l == 0)
    def _():
        acc_ref[...] = jnp.zeros_like(acc_ref)

    x = x_ref[...].astype(jnp.float32)                      # (TB, C, TL)
    if L % TL != 0:
        # Mask lanes past the true length so padded garbage does not bias the
        # mean (last L-block is partial).
        lane = lax.broadcasted_iota(jnp.int32, x.shape, 2)
        x = jnp.where(l * TL + lane < L, x, 0.0)
    acc_ref[...] += jnp.sum(x, axis=-1)                     # partial sum over L

    @pl.when(l == pl.num_programs(1) - 1)
    def _():
        # AdaptiveAvgPool1d(1): divide by the true L once, at finalize.
        y = acc_ref[...] * (1.0 / L)                        # (TB, C)
        # fc[0]: Linear(C -> H, bias=False) + ReLU.  Contract dim 1 of both
        # operands (PyTorch Linear weight is (out, in)) -> no transpose copy.
        h = lax.dot_general(
            y, w1_ref[...].astype(jnp.float32),
            (((1,), (1,)), ((), ())),
            preferred_element_type=jnp.float32)             # (TB, H)
        h = jnp.maximum(h, 0.0)
        # fc[2]: Linear(H -> C, bias=False) + Sigmoid.
        s = lax.dot_general(
            h, w2_ref[...].astype(jnp.float32),
            (((1,), (1,)), ((), ())),
            preferred_element_type=jnp.float32)             # (TB, C)
        o_ref[...] = jax.nn.sigmoid(s).astype(o_ref.dtype)


def _pick_tl(L, TB, C, itemsize, budget_bytes=6 * 1024 * 1024):
    """Largest lane-tile that keeps the double-buffered x tile under budget."""
    if L <= 128:
        return L                                   # full dim is always legal
    per_lane = 2 * TB * C * itemsize               # 2x for double buffering
    tl = max(128, (budget_bytes // per_lane) // 128 * 128)
    tl = min(tl, (L // 128) * 128)                 # stay a 128-multiple <= L
    return max(128, tl)


def se_layer(x, w1, w2, *, tb=None, tl=None,
             vmem_limit_bytes=32 * 1024 * 1024):
    """x: (B, C, L); w1: (C//r, C); w2: (C, C//r). Returns (B, C, 1)."""
    B, C, L = x.shape
    H = w1.shape[0]
    assert w1.shape == (H, C) and w2.shape == (C, H)
    itemsize = jnp.dtype(x.dtype).itemsize

    TB = tb if tb is not None else (B if B <= 8 else 8)
    TL = tl if tl is not None else _pick_tl(L, TB, C, itemsize)
    nb = pl.cdiv(B, TB)
    nl = pl.cdiv(L, TL)

    kernel = functools.partial(_se_kernel, L=L, TL=TL)

    cost = pl.CostEstimate(
        flops=2 * B * C * L + 2 * B * (C * H + H * C),
        transcendentals=B * C,
        bytes_accessed=int(B * C * L * itemsize
                           + 2 * H * C * jnp.dtype(w1.dtype).itemsize
                           + B * C * itemsize),
    )

    out = pl.pallas_call(
        kernel,
        out_shape=jax.ShapeDtypeStruct((B, C), x.dtype),
        grid_spec=pltpu.PrefetchScalarGridSpec(
            num_scalar_prefetch=0,
            grid=(nb, nl),
            in_specs=[
                pl.BlockSpec((TB, C, TL), lambda b, l: (b, 0, l)),
                pl.BlockSpec((H, C), lambda b, l: (0, 0)),   # resident weights
                pl.BlockSpec((C, H), lambda b, l: (0, 0)),
            ],
            out_specs=pl.BlockSpec((TB, C), lambda b, l: (b, 0)),
            scratch_shapes=[pltpu.VMEM((TB, C), jnp.float32)],
        ),
        compiler_params=pltpu.CompilerParams(
            dimension_semantics=("parallel", "arbitrary"),
            vmem_limit_bytes=vmem_limit_bytes,
        ),
        cost_estimate=cost,
    )(x, w1, w2)
    return out.reshape(B, C, 1)


def se_layer_ref(x, w1, w2):
    y = jnp.mean(x.astype(jnp.float32), axis=-1)
    h = jnp.maximum(y @ w1.astype(jnp.float32).T, 0.0)
    s = jax.nn.sigmoid(h @ w2.astype(jnp.float32).T)
    return s.astype(x.dtype).reshape(x.shape[0], x.shape[1], 1)


if __name__ == "__main__":
    # Small shapes consistent with the module: in_channels=64, reduction=16.
    B, C = 2, 64
    reduction = 16
    H = C // reduction  # 4

    key = jax.random.PRNGKey(0)
    kx, k1, k2, kx2 = jax.random.split(key, 4)

    bound1 = 1.0 / jnp.sqrt(C)
    bound2 = 1.0 / jnp.sqrt(H)
    w1 = jax.random.uniform(k1, (H, C), minval=-bound1, maxval=bound1,
                            dtype=jnp.float32)
    w2 = jax.random.uniform(k2, (C, H), minval=-bound2, maxval=bound2,
                            dtype=jnp.float32)

    # Case 1: f32, auto tile sizes.
    L = 256
    x = jax.random.normal(kx, (B, C, L), dtype=jnp.float32)
    y = se_layer(x, w1, w2)
    jax.block_until_ready(y)
    assert y.shape == (B, C, 1)
    assert jnp.allclose(y, se_layer_ref(x, w1, w2), atol=1e-5, rtol=1e-5)

    # Case 2: forced TL=128 -> multi-step streaming reduction over L.
    y2 = se_layer(x, w1, w2, tb=B, tl=128)
    jax.block_until_ready(y2)
    assert jnp.allclose(y2, se_layer_ref(x, w1, w2), atol=1e-5, rtol=1e-5)

    # Case 3: L not a multiple of the tile -> exercises the tail mask.
    L3 = 200
    x3 = jax.random.normal(kx2, (B, C, L3), dtype=jnp.float32)
    y3 = se_layer(x3, w1, w2, tb=B, tl=128)
    jax.block_until_ready(y3)
    assert jnp.allclose(y3, se_layer_ref(x3, w1, w2), atol=1e-5, rtol=1e-5)

    # Case 4: bf16 input path (half the HBM bytes; f32 accumulation inside).
    xb = x.astype(jnp.bfloat16)
    yb = se_layer(xb, w1, w2, tb=B, tl=128)
    jax.block_until_ready(yb)
    assert jnp.allclose(yb.astype(jnp.float32),
                        se_layer_ref(xb, w1, w2).astype(jnp.float32),
                        atol=1e-2, rtol=1e-2)

    print("KERNEL_OK")
</pallas_src>

<mosaic_0001>
module attributes {stable_mosaic.version = 11 : i64} {
  func.func @_se_kernel(%arg0: i32, %arg1: i32, %arg2: memref<2x64x256xf32, #tpu.memory_space<vmem>>, %arg3: memref<4x64xf32, #tpu.memory_space<vmem>>, %arg4: memref<64x4xf32, #tpu.memory_space<vmem>>, %arg5: memref<2x64xf32, #tpu.memory_space<vmem>>, %arg6: memref<2x64xf32, #tpu.memory_space<vmem>>) attributes {dimension_semantics = [#tpu.dimension_semantics<parallel>, #tpu.dimension_semantics<arbitrary>], iteration_bounds = array<i64: 1, 1>, scalar_prefetch = 0 : i64, scratch_operands = 1 : i64, tpu.core_type = #tpu.core_type<tc>, window_params = [{transform_indices = @transform_0, window_bounds = array<i64: 2, 64, 256>}, {pipeline_mode = #tpu.pipeline_mode<synchronous>, transform_indices = @transform_1, window_bounds = array<i64: 4, 64>}, {pipeline_mode = #tpu.pipeline_mode<synchronous>, transform_indices = @transform_2, window_bounds = array<i64: 64, 4>}, {transform_indices = @transform_3, window_bounds = array<i64: 2, 64>}]} {
    %c0_i32 = arith.constant 0 : i32
    %0 = arith.cmpi eq, %arg1, %c0_i32 : i32
    %1 = arith.extui %0 : i1 to i32
    %c0_i32_0 = arith.constant 0 : i32
    %2 = arith.cmpi ne, %1, %c0_i32_0 : i32
    scf.if %2 {
      %cst_9 = arith.constant 0.000000e+00 : f32
      %11 = vector.broadcast %cst_9 : f32 to vector<2x64xf32>
      %c0_10 = arith.constant 0 : index
      %c0_11 = arith.constant 0 : index
      %12 = vector.load %arg6[%c0_10, %c0_11] : memref<2x64xf32, #tpu.memory_space<vmem>>, vector<2x64xf32>
      tpu.vector_store %arg6[%c0_10, %c0_11], %11 {strides = array<i32>} : memref<2x64xf32, #tpu.memory_space<vmem>>, vector<2x64xf32>,
    } else {
    }
    %c0 = arith.constant 0 : index
    %c0_1 = arith.constant 0 : index
    %c0_2 = arith.constant 0 : index
    %3 = vector.load %arg2[%c0, %c0_1, %c0_2] : memref<2x64x256xf32, #tpu.memory_space<vmem>>, vector<2x64x256xf32>
    %c0_3 = arith.constant 0 : index
    %c0_4 = arith.constant 0 : index
    %4 = vector.load %arg6[%c0_3, %c0_4] : memref<2x64xf32, #tpu.memory_space<vmem>>, vector<2x64xf32>
    %cst = arith.constant dense<0.000000e+00> : vector<2x64xf32>
    %5 = vector.multi_reduction <add>, %3, %cst [2] : vector<2x64x256xf32> to vector<2x64xf32>
    %6 = arith.addf %4, %5 : vector<2x64xf32>
    %c0_5 = arith.constant 0 : index
    %c0_6 = arith.constant 0 : index
    %7 = vector.load %arg6[%c0_5, %c0_6] : memref<2x64xf32, #tpu.memory_space<vmem>>, vector<2x64xf32>
    tpu.vector_store %arg6[%c0_5, %c0_6], %6 {strides = array<i32>} : memref<2x64xf32, #tpu.memory_space<vmem>>, vector<2x64xf32>,
    %c0_i32_7 = arith.constant 0 : i32
    %8 = arith.cmpi eq, %arg1, %c0_i32_7 : i32
    %9 = arith.extui %8 : i1 to i32
    %c0_i32_8 = arith.constant 0 : i32
    %10 = arith.cmpi ne, %9, %c0_i32_8 : i32
    scf.if %10 {
      %c0_9 = arith.constant 0 : index
      %c0_10 = arith.constant 0 : index
      %11 = vector.load %arg6[%c0_9, %c0_10] : memref<2x64xf32, #tpu.memory_space<vmem>>, vector<2x64xf32>
      %cst_11 = arith.constant 3.906250e-03 : f32
      %12 = vector.broadcast %cst_11 : f32 to vector<2x64xf32>
      %13 = arith.mulf %11, %12 : vector<2x64xf32>
      %c0_12 = arith.constant 0 : index
      %c0_13 = arith.constant 0 : index
      %14 = vector.load %arg3[%c0_12, %c0_13] : memref<4x64xf32, #tpu.memory_space<vmem>>, vector<4x64xf32>
      %cst_14 = arith.constant dense<0.000000e+00> : vector<2x4xf32>
      %15 = tpu.matmul %13, %14, %cst_14 {dimension_numbers = #tpu.dot_dimension_numbers<[1], [1], [0], [0], [0, 0, 1, 0], [], []>} : vector<2x64xf32>, vector<4x64xf32>, vector<2x4xf32> -> vector<2x4xf32>
      %cst_15 = arith.constant 0.000000e+00 : f32
      %16 = vector.broadcast %cst_15 : f32 to vector<2x4xf32>
      %17 = arith.maximumf %15, %16 : vector<2x4xf32>
      %c0_16 = arith.constant 0 : index
      %c0_17 = arith.constant 0 : index
      %18 = vector.load %arg4[%c0_16, %c0_17] : memref<64x4xf32, #tpu.memory_space<vmem>>, vector<64x4xf32>
      %cst_18 = arith.constant dense<0.000000e+00> : vector<2x64xf32>
      %19 = tpu.matmul %17, %18, %cst_18 {dimension_numbers = #tpu.dot_dimension_numbers<[1], [1], [0], [0], [0, 0, 1, 0], [], []>} : vector<2x4xf32>, vector<64x4xf32>, vector<2x64xf32> -> vector<2x64xf32>
      %20 = arith.negf %19 : vector<2x64xf32>
      %21 = math.exp %20 : vector<2x64xf32>
      %cst_19 = arith.constant 1.000000e+00 : f32
      %22 = vector.broadcast %cst_19 : f32 to vector<2x64xf32>
      %23 = arith.addf %22, %21 : vector<2x64xf32>
      %24 = arith.divf %22, %23 : vector<2x64xf32>
      %c0_20 = arith.constant 0 : index
      %c0_21 = arith.constant 0 : index
      %25 = vector.load %arg5[%c0_20, %c0_21] : memref<2x64xf32, #tpu.memory_space<vmem>>, vector<2x64xf32>
      tpu.vector_store %arg5[%c0_20, %c0_21], %24 {strides = array<i32>} : memref<2x64xf32, #tpu.memory_space<vmem>>, vector<2x64xf32>,
    } else {
    }
    return
  }
  func.func @transform_0(%arg0: i32, %arg1: i32) -> (i32, i32, i32) {
    %c0_i32 = arith.constant 0 : i32
    %c0_i32_0 = arith.constant 0 : i32
    return %arg0, %c0_i32, %arg1 : i32, i32, i32
  }
  func.func @transform_1(%arg0: i32, %arg1: i32) -> (i32, i32) {
    %c0_i32 = arith.constant 0 : i32
    %c0_i32_0 = arith.constant 0 : i32
    %c0_i32_1 = arith.constant 0 : i32
    return %c0_i32, %c0_i32_0 : i32, i32
  }
  func.func @transform_2(%arg0: i32, %arg1: i32) -> (i32, i32) {
    %c0_i32 = arith.constant 0 : i32
    %c0_i32_0 = arith.constant 0 : i32
    %c0_i32_1 = arith.constant 0 : i32
    return %c0_i32, %c0_i32_0 : i32, i32
  }
  func.func @transform_3(%arg0: i32, %arg1: i32) -> (i32, i32) {
    %c0_i32 = arith.constant 0 : i32
    %c0_i32_0 = arith.constant 0 : i32
    return %arg0, %c0_i32 : i32, i32
  }
}

</mosaic_0001>

<bundles_post_ra>
// kernel: tpu_custom_call.1
= control target key start
LH: loop header
LB: loop body
LE: loop exit
PB: predicated region body
PF: predicated region fallthrough
CT: control target
= control target key end

     0   :  { %8 = vsyncpa [#allocation4], 0  ;;  %s466_s0 = inlined_call_operand.hbm [shape: f32[2,64,256], index: 0, kind: input, shape index: {}]   ;;  %s467_s1 = inlined_call_operand.vmem [shape: f32[4,64], index: 1, kind: input, shape index: {}]   ;;  %s468_s2 = inlined_call_operand.vmem [shape: f32[64,4], index: 2, kind: input, shape index: {}]   ;;  %s469_s3 = inlined_call_operand.hbm [shape: f32[2,64], index: 3, kind: output, shape index: {}]  }
   0x1   :  { %9 = vsyncpa [#allocation5], 0  ;;  %s14_s14 = sshll.u32 %s466_s0, 4  ;;  %s386_s15 = smov [#allocation3]   ;;  %s15_s14 = int_to_ptr.hbm [resolvable:$true] %s14_s14 }
   0x2   :  { %s16_s16 = sshll.u32 %s386_s15, 4  ;;  %s387_s17 = smov 256   ;;  %s17_s16 = int_to_ptr.vmem [resolvable:$true] %s16_s16 }
   0x3   :  { %s388_s18 = smov 16  }
   0x4   :  { %22 = dma.hbm_to_vmem [thread:$0]  %s15_s14, 4096, %s17_s16, [#allocation4], %s387_s17, %s387_s17, %s388_s18  }
   0x5   :  { %382 = dma.done.wait [#allocation4], 4096  }
   0x6   :  { %383 = vsyncadd [#allocation4], 4294963200  ;;  %v53_v0 = vld [vmem:[#allocation3 + $0x80] sm:$0xff]  ;;  %v54_v1 = vld [vmem:[#allocation3 + $0x88] sm:$0xff]  ;;  %vm35_vm0 = vcmask 517120   ;;  %v389_v51 = vmov 0.0   ;;  %v134_v59 = vlaneseq }
   0x7   :  { %v37_v2 = vld [vmem:[#allocation3] sm:$0xff]  ;;  %v94_v3 = vadd.f32 %v54_v1, %v53_v0  ;;  %v38_v4 = vld [vmem:[#allocation3 + $0x8] sm:$0xff]  ;;  %v55_v9 = vld [vmem:[#allocation3 + $0x90] sm:$0xff]  ;;  %36 = vst.msk [vmem:[#allocation2] sm:$0x3] %vm35_vm0, %v389_v51  ;;  %vm192_vm1 = vcmask 523264  }
   0x8   :  { %v41_v5 = vld [vmem:[#allocation3 + $0x20] sm:$0xff]  ;;  %v42_v6 = vld [vmem:[#allocation3 + $0x28] sm:$0xff]  ;;  %v70_v7 = vadd.f32 %v38_v4, %v37_v2  ;;  %v56_v10 = vld [vmem:[#allocation3 + $0x98] sm:$0xff]  ;;  %v135_v60 = vand.u32 127, %v134_v59  ;;  %vm228_vm2 = vcmask 31744   ;;  %vm139_vm3 = vcmask 130112  }
   0x9   :  { %v76_v8 = vadd.f32 %v42_v6, %v41_v5  ;;  %95 = vadd.xlane.f32.xlu1 %v94_v3  ;;  %v39_v11 = vld [vmem:[#allocation3 + $0x10] sm:$0xff]  ;;  %v40_v12 = vld [vmem:[#allocation3 + $0x18] sm:$0xff]  ;;  %v57_v13 = vld [vmem:[#allocation3 + $0xa0] sm:$0xff]  ;;  %v97_v15 = vadd.f32 %v56_v10, %v55_v9  ;;  %vm143_vm4 = vcmask 195712   ;;  %vm147_vm5 = vcmask 261312   ;;  %s303_s11 = sshll.u32 %s469_s3, 4  ;;  %s304_s11 = int_to_ptr.hbm [resolvable:$true] %s303_s11 }
   0xa   :  { %71 = vadd.xlane.f32.xlu0 %v70_v7  ;;  %v58_v14 = vld [vmem:[#allocation3 + $0xa8] sm:$0xff]  ;;  %v73_v16 = vadd.f32 %v40_v12, %v39_v11  ;;  %v59_v18 = vld [vmem:[#allocation3 + $0xb0] sm:$0xff]  ;;  %v60_v19 = vld [vmem:[#allocation3 + $0xb8] sm:$0xff]  ;;  %v137_v61 = vadd.s32 4294967288, %v135_v60  ;;  %v141_v1 = vadd.s32 4294967280, %v135_v60  ;;  %v145_v4 = vadd.s32 4294967272, %v135_v60 }
   0xb   :  { %77 = vadd.xlane.f32.xlu2 %v76_v8  ;;  %v100_v17 = vadd.f32 %v58_v14, %v57_v13  ;;  %v43_v20 = vld [vmem:[#allocation3 + $0x30] sm:$0xff]  ;;  %v44_v21 = vld [vmem:[#allocation3 + $0x38] sm:$0xff]  ;;  %v45_v22 = vld [vmem:[#allocation3 + $0x40] sm:$0xff]  ;;  %v103_v24 = vadd.f32 %v60_v19, %v59_v18  ;;  %v149_v10 = vadd.s32 4294967264, %v135_v60  ;;  %v153_v13 = vadd.s32 4294967256, %v135_v60 }
   0xc   :  { %v46_v23 = vld [vmem:[#allocation3 + $0x48] sm:$0xff]  ;;  %v79_v25 = vadd.f32 %v44_v21, %v43_v20  ;;  %v47_v27 = vld [vmem:[#allocation3 + $0x50] sm:$0xff]  ;;  %v48_v28 = vld [vmem:[#allocation3 + $0x58] sm:$0xff]  ;;  %vm151_vm6 = vcmask 326912   ;;  %vm155_vm7 = vcmask 392512   ;;  %vm159_vm8 = vcmask 458112  }
   0xd   :  { %v82_v26 = vadd.f32 %v46_v23, %v45_v22  ;;  %v61_v29 = vld [vmem:[#allocation3 + $0xc0] sm:$0xff]  ;;  %v62_v30 = vld [vmem:[#allocation3 + $0xc8] sm:$0xff]  ;;  %v63_v31 = vld [vmem:[#allocation3 + $0xd0] sm:$0xff]  ;;  %v85_v33 = vadd.f32 %v48_v28, %v47_v27  ;;  %vm163_vm9 = vcmask 523712   ;;  %vm180_vm10 = vcmask 1041409  }
   0xe   :  { %v64_v32 = vld [vmem:[#allocation3 + $0xd8] sm:$0xff]  ;;  %v106_v34 = vadd.f32 %v62_v30, %v61_v29  ;;  %v65_v36 = vld [vmem:[#allocation3 + $0xe0] sm:$0xff]  ;;  %v66_v37 = vld [vmem:[#allocation3 + $0xe8] sm:$0xff] }
   0xf   :  { %v109_v35 = vadd.f32 %v64_v32, %v63_v31  ;;  %v49_v38 = vld [vmem:[#allocation3 + $0x60] sm:$0xff]  ;;  %v50_v39 = vld [vmem:[#allocation3 + $0x68] sm:$0xff]  ;;  %v51_v40 = vld [vmem:[#allocation3 + $0x70] sm:$0xff]  ;;  %v112_v42 = vadd.f32 %v66_v37, %v65_v36 }
  0x10   :  { %v52_v41 = vld [vmem:[#allocation3 + $0x78] sm:$0xff]  ;;  %v88_v43 = vadd.f32 %v50_v39, %v49_v38  ;;  %v67_v45 = vld [vmem:[#allocation3 + $0xf0] sm:$0xff]  ;;  %v225_v14 = vld [vmem:[%s468_s2 + $0x28] sm:$0xff] }
  0x11   :  { %98 = vadd.xlane.f32.xlu1 %v97_v15  ;;  %v91_v44 = vadd.f32 %v52_v41, %v51_v40  ;;  %v68_v46 = vld [vmem:[#allocation3 + $0xf8] sm:$0xff]  ;;  %v226_v5 = vld [vmem:[%s468_s2 + $0x30] sm:$0xff] }
  0x12   :  { %74 = vadd.xlane.f32.xlu0 %v73_v16  ;;  %v115_v47 = vadd.f32 %v68_v46, %v67_v45  ;;  %v191_v56 = vld [vmem:[%s467_s1] sm:$0xf]  ;;  %v227_v0 = vld [vmem:[%s468_s2 + $0x38] sm:$0xff]  ;;  %v157_v16 = vadd.s32 4294967248, %v135_v60 }
  0x13   :  { %101 = vadd.xlane.f32.xlu2 %v100_v17  ;;  %313 = vmatpush.xpose.msk.msra.mxu0 %vm192_vm1, %v191_v56  ;;  %v224_v27 = vld [vmem:[%s468_s2 + $0x20] sm:$0xff]  ;;  %v223_v38 = vld [vmem:[%s468_s2 + $0x18] sm:$0xff] }
  0x14   :  { %315 = vmatpush.xpose.msk.msra.mxu1 %vm228_vm2, %v227_v0 }
  0x18   :  { %316 = vmatpush.xpose.msk.msra.mxu1 %vm228_vm2, %v226_v5 }
  0x19   :  { %104 = vadd.xlane.f32.xlu1 %v103_v24 }
  0x1a   :  { %80 = vadd.xlane.f32.xlu0 %v79_v25 }
  0x1b   :  { %83 = vadd.xlane.f32.xlu2 %v82_v26  ;;  %v161_v26 = vadd.s32 4294967240, %v135_v60 }
  0x1c   :  { %317 = vmatpush.xpose.msk.msra.mxu1 %vm228_vm2, %v225_v14 }
  0x20   :  { %318 = vmatpush.xpose.msk.msra.mxu1 %vm228_vm2, %v224_v27 }
  0x21   :  { %86 = vadd.xlane.f32.xlu1 %v85_v33 }
  0x22   :  { %107 = vadd.xlane.f32.xlu0 %v106_v34 }
  0x23   :  { %110 = vadd.xlane.f32.xlu2 %v109_v35 }
  0x24   :  { %319 = vmatpush.xpose.msk.msra.mxu1 %vm228_vm2, %v223_v38 }
  0x29   :  { %113 = vadd.xlane.f32.xlu1 %v112_v42 }
  0x2a   :  { %89 = vadd.xlane.f32.xlu0 %v88_v43 }
  0x2b   :  { %92 = vadd.xlane.f32.xlu2 %v91_v44  ;;  %v69_v44 = vld [vmem:[#allocation2] sm:$0x3] }
  0x32   :  { %116 = vadd.xlane.f32.xlu0 %v115_v47  ;;  %v222_v47 = vld [vmem:[%s468_s2 + $0x10] sm:$0xff] }
  0x33   :  { %320 = vmatpush.xpose.msk.msra.mxu1 %vm228_vm2, %v222_v47 }
  0x7c   :  { %v96_v48 = vpop.xlane.xlu1 %95 }
  0x7d   :  { %v72_v49 = vpop.xlane.xlu0 %71  ;;  %v165_v6 = vperm.slane %v96_v48, %v135_v60 }
  0x7e   :  { %v78_v50 = vpop.xlane.xlu2 %77  ;;  %v136_v7 = vperm.slane %v72_v49, %v135_v60 }
  0x7f   :  { %v142_v9 = vperm.slane %v78_v50, %v141_v1  ;;  %v221_v50 = vld [vmem:[%s468_s2 + $0x8] sm:$0xff] }
  0x80   :  { %321 = vmatpush.xpose.msk.msra.mxu1 %vm228_vm2, %v221_v50 }
  0x84   :  { %v99_v52 = vpop.xlane.xlu1 %98 }
  0x85   :  { %v75_v53 = vpop.xlane.xlu0 %74  ;;  %v166_v8 = vperm.slane %v99_v52, %v137_v61 }
  0x86   :  { %v102_v54 = vpop.xlane.xlu2 %101  ;;  %v138_v3 = vperm.slane %v75_v53, %v137_v61  ;;  %v220_v53 = vld [vmem:[%s468_s2] sm:$0xff]  ;;  %s390_s2 = smov [#allocation6]  }
  0x87   :  { %v168_v15 = vperm.slane %v102_v54, %v141_v1  ;;  %v167_v18 = vsel %vm139_vm3, %v166_v8, %v165_v6  ;;  %322 = vmatpush.xpose.msk.msra.mxu1 %vm228_vm2, %v220_v53  ;;  %s301_s8 = sshll.u32 %s390_s2, 4  ;;  %s302_s8 = int_to_ptr.vmem [resolvable:$true] %s301_s8 }
  0x88   :  { %v140_v11 = vsel %vm139_vm3, %v138_v3, %v136_v7 }
  0x89   :  { %v144_v20 = vsel %vm143_vm4, %v142_v9, %v140_v11  ;;  %v169_v28 = vsel %vm143_vm4, %v168_v15, %v167_v18 }
  0x8c   :  { %v105_v55 = vpop.xlane.xlu1 %104 }
  0x8d   :  { %v81_v57 = vpop.xlane.xlu0 %80  ;;  %v170_v19 = vperm.slane %v105_v55, %v145_v4 }
  0x8e   :  { %v84_v58 = vpop.xlane.xlu2 %83  ;;  %v146_v12 = vperm.slane %v81_v57, %v145_v4 }
  0x8f   :  { %v150_v21 = vperm.slane %v84_v58, %v149_v10  ;;  %v171_v31 = vsel %vm147_vm5, %v170_v19, %v169_v28 }
  0x90   :  { %v148_v23 = vsel %vm147_vm5, %v146_v12, %v144_v20 }
  0x91   :  { %v152_v33 = vsel %vm151_vm6, %v150_v21, %v148_v23 }
  0x94   :  { %v87_v63 = vpop.xlane.xlu1 %86 }
  0x95   :  { %v108_v62 = vpop.xlane.xlu0 %107  ;;  %v154_v24 = vperm.slane %v87_v63, %v153_v13 }
  0x96   :  { %v111_v2 = vpop.xlane.xlu2 %110  ;;  %v172_v22 = vperm.slane %v108_v62, %v149_v10 }
  0x97   :  { %v174_v32 = vperm.slane %v111_v2, %v153_v13  ;;  %v156_v36 = vsel %vm155_vm7, %v154_v24, %v152_v33 }
  0x98   :  { %v173_v34 = vsel %vm151_vm6, %v172_v22, %v171_v31 }
  0x99   :  { %v175_v41 = vsel %vm155_vm7, %v174_v32, %v173_v34 }
  0x9c   :  { %v114_v25 = vpop.xlane.xlu1 %113 }
  0x9d   :  { %v90_v17 = vpop.xlane.xlu0 %89  ;;  %v176_v35 = vperm.slane %v114_v25, %v157_v16 }
  0x9e   :  { %v158_v29 = vperm.slane %v90_v17, %v157_v16  ;;  %v93_v30 = vpop.xlane.xlu2 %92 }
  0x9f   :  { %v162_v37 = vperm.slane %v93_v30, %v161_v26  ;;  %v177_v43 = vsel %vm159_vm8, %v176_v35, %v175_v41 }
  0xa0   :  { %v160_v39 = vsel %vm159_vm8, %v158_v29, %v156_v36 }
  0xa1   :  { %v164_v45 = vsel %vm163_vm9, %v162_v37, %v160_v39 }
  0xa5   :  { %v117_v40 = vpop.xlane.xlu0 %116 }
  0xa6   :  { %v178_v42 = vperm.slane %v117_v40, %v161_v26 }
  0xa8   :  { %v179_v46 = vsel %vm163_vm9, %v178_v42, %v177_v43 }
  0xa9   :  { %v181_v48 = vsel %vm180_vm10, %v179_v46, %v164_v45 }
  0xaa   :  { %v183_v49 = vadd.f32 %v181_v48, %v69_v44 }
  0xac   :  { %185 = vst.msk [vmem:[#allocation2] sm:$0x3] %vm35_vm0, %v183_v49 }
  0xb3   :  { %v189_v51 = vld [vmem:[#allocation2] sm:$0x3] }
  0xb4   :  { %v190_v52 = vmul.f32 0.00390625, %v189_v51 }
  0xb6   :  { %314 = vmatmul.msk.f32.vlgmr.msra.gmra.mxu0 %vm192_vm1, %v190_v52 }
 0x133   :  { %v216_v54 = vpop.f32.mrf.mxu0 }
 0x134   :  { %v219_v55 = vmax.f32 %v216_v54, 0.0 }
 0x136   :  { %323 = vmatmul.msk.f32.vlgmr.msra.gmra.mxu1 %vm228_vm2, %v219_v55 }
 0x1b3   :  { %v273_v56 = vpop.f32.mrf.mxu1 }
 0x1b4   :  { %v324_v57 = vmul.f32 -1.442695, %v273_v56 }
 0x1b6   :  { %330 = vpow2.f32 %v324_v57 }
 0x1bc   :  { %v331_v58 = vpop.eup %330 }
 0x1bd   :  { %v279_v59 = vadd.f32 1.0, %v331_v58 }
 0x1bf   :  { %332 = vrcp.f32 %v279_v59  ;;  %v291_v63 = vand.u32 2147483648, %v279_v59  ;;  %v289_v1 = vand.u32 2147483647, %v279_v59  ;;  %vm285_vm12 = vweird.f32 %v279_v59 }
 0x1c1   :  { %v292_v3 = vor.u32 1.1754944e-38, %v291_v63  ;;  %vm290_vm14 = vcmp.eq.f32.partialorder %v289_v1, 8.507059e+37 }
 0x1c5   :  { %v333_v60 = vpop.eup %332 }
 0x1c6   :  { %v281_v61 = vmul.f32 %v333_v60, %v279_v59  ;;  %vm286_vm11 = vweird.f32 %v333_v60 }
 0x1c7   :  { %vm287_vm13 = vmor %vm285_vm12, %vm286_vm11 }
 0x1c8   :  { %v282_v62 = vsub.f32 1.0, %v281_v61 }
 0x1ca   :  { %v283_v0 = vmul.f32 %v333_v60, %v282_v62 }
 0x1cc   :  { %v284_v2 = vadd.f32 %v333_v60, %v283_v0 }
 0x1ce   :  { %v288_v4 = vsel %vm287_vm13, %v333_v60, %v284_v2 }
 0x1cf   :  { %v293_v5 = vsel %vm290_vm14, %v292_v3, %v288_v4 }
 0x1d0   :  { %295 = vst.msk [vmem:[#allocation6] sm:$0x3] %vm35_vm0, %v293_v5 }
 0x1d1   :  { %306 = dma.vmem_to_hbm [thread:$0]  %s302_s8, 32, %s304_s11, [#allocation5]  }
 0x1d2   :  { %384 = dma.done.wait [#allocation5], 32  }
 0x1d3   :  { %385 = vsyncadd [#allocation5], 4294967264 }
 0x1d4   :  { %311 = vsyncpa [#allocation4], 1 }
 0x1d5   :  { %312 = vsyncpa [#allocation5], 1 }

</bundles_post_ra>
